<compile_context>
chip_gen: v7x
topology: tpu7x:2x2x1
jax: 0.10.0
libtpu: 0.0.40
codegen_flags: <defaults>
</compile_context>

<pallas_src>
import jax
import jax.numpy as jnp
from jax.experimental import pallas as pl
from jax.experimental import pallas as pl  # noqa: F811 (kept single import)
from jax.experimental.pallas import tpu as pltpu  # noqa: F401 (not needed at toy shapes)


def _corrector_kernel(patches_ref, w_ref, resid_ref, out_ref):
    """Single fused step.

    patches_ref: (9*C_in + 1, B*HW)  im2col patches + ones row (bias fold)
    w_ref      : (C_out, 9*C_in + 1) conv weight (+ bias column)
    resid_ref  : (C_out, B*HW)       first n_classes channels of x
    out_ref    : (C_out, B*HW)
    """
    acc = resid_ref[...].astype(jnp.float32)
    acc = acc + jnp.dot(w_ref[...], patches_ref[...],
                        preferred_element_type=jnp.float32)
    out_ref[...] = acc.astype(out_ref.dtype)


def corrector_forward(x_nchw, weight_hwio, bias, n_classes):
    """Reproduces Corrector.forward for a 3x3-conv 'unet'.

    x_nchw     : (B, C_in, H, W) float32
    weight_hwio: (3, 3, C_in, n_classes) float32
    bias       : (n_classes,) float32
    returns    : (B, n_classes, H, W) float32
    """
    B, C_in, H, W = x_nchw.shape
    C_out = n_classes
    HW = H * W
    L = B * HW                    # fused batch*spatial lane axis (multiple of 128)
    K = 9 * C_in + 1              # 9 taps * channels + 1 ones-row for bias

    # --- wrapper-side im2col, fused-batch layout: (9, C_in, B, H, W) ---------
    x_pad = jnp.pad(x_nchw, ((0, 0), (0, 0), (1, 1), (1, 1)))
    taps = jnp.stack(
        [x_pad[:, :, kh:kh + H, kw:kw + W]
         for kh in range(3) for kw in range(3)],
        axis=0)                                        # (9, B, C_in, H, W)
    patches = jnp.transpose(taps, (0, 2, 1, 3, 4)).reshape(9 * C_in, L)
    # Bias fold: append a ones row -> K = 9*C_in + 1.
    patches_aug = jnp.concatenate(
        [patches, jnp.ones((1, L), dtype=patches.dtype)], axis=0)  # (K, L)

    # (3,3,C_in,C_out) -> (C_out, kh, kw, ci) flatten, matching patch ordering,
    # then append the bias column.
    w_mat = jnp.transpose(weight_hwio, (3, 0, 1, 2)).reshape(C_out, 9 * C_in)
    w_aug = jnp.concatenate([w_mat, bias.reshape(C_out, 1)], axis=1)  # (C_out, K)

    # Residual: only the first n_classes channels are DMA'd into the kernel.
    resid = jnp.transpose(x_nchw[:, :C_out], (1, 0, 2, 3)).reshape(C_out, L)

    out = pl.pallas_call(
        _corrector_kernel,
        out_shape=jax.ShapeDtypeStruct((C_out, L), x_nchw.dtype),
        grid=(1,),                                    # single fused step
        in_specs=[
            pl.BlockSpec((K, L), lambda i: (0, 0)),
            pl.BlockSpec((C_out, K), lambda i: (0, 0)),
            pl.BlockSpec((C_out, L), lambda i: (0, 0)),
        ],
        out_specs=pl.BlockSpec((C_out, L), lambda i: (0, 0)),
    )(patches_aug, w_aug, resid)

    # (C_out, B*HW) -> (B, C_out, H, W); tiny wrapper-side transpose (8 KiB).
    return jnp.transpose(out.reshape(C_out, B, H, W), (1, 0, 2, 3))


def _reference_forward(x_nchw, weight_hwio, bias, n_classes):
    """Pure-JAX reference (NCHW semantics, same as the PyTorch module)."""
    unet_out = jax.lax.conv_general_dilated(
        x_nchw, weight_hwio,
        window_strides=(1, 1), padding="SAME",
        dimension_numbers=("NCHW", "HWIO", "NCHW"))
    unet_out = unet_out + bias.reshape(1, -1, 1, 1)
    o_first = x_nchw[:, :n_classes]
    return o_first + unet_out


if __name__ == "__main__":
    # Small synthetic shapes: batch=2, n_classes=4, input channels=8, spatial=16.
    B, n_classes, H, W = 2, 4, 16, 16
    C_in = 2 * n_classes  # so torch.split(dim=-3) yields >=1 chunk of n_classes

    key = jax.random.PRNGKey(0)
    kx, kw, kb = jax.random.split(key, 3)
    x = jax.random.normal(kx, (B, C_in, H, W), dtype=jnp.float32)
    weight = (jax.random.normal(kw, (3, 3, C_in, n_classes), dtype=jnp.float32)
              * 0.1)
    bias = jax.random.normal(kb, (n_classes,), dtype=jnp.float32) * 0.1

    out = corrector_forward(x, weight, bias, n_classes)
    out = jax.block_until_ready(out)

    ref = _reference_forward(x, weight, bias, n_classes)
    assert out.shape == (B, n_classes, H, W)
    assert jnp.allclose(out, ref, atol=1e-4, rtol=1e-4), "mismatch vs reference"

    print("KERNEL_OK")
</pallas_src>

<mosaic_0001>
module attributes {stable_mosaic.version = 11 : i64} {
  func.func @_corrector_kernel(%arg0: i32, %arg1: memref<73x512xf32, #tpu.memory_space<vmem>>, %arg2: memref<4x73xf32, #tpu.memory_space<vmem>>, %arg3: memref<4x512xf32, #tpu.memory_space<vmem>>, %arg4: memref<4x512xf32, #tpu.memory_space<vmem>>) attributes {dimension_semantics = [#tpu.dimension_semantics<arbitrary>], iteration_bounds = array<i64: 1>, scalar_prefetch = 0 : i64, scratch_operands = 0 : i64, tpu.core_type = #tpu.core_type<tc>, window_params = [{pipeline_mode = #tpu.pipeline_mode<synchronous>, transform_indices = @transform_0, window_bounds = array<i64: 73, 512>}, {pipeline_mode = #tpu.pipeline_mode<synchronous>, transform_indices = @transform_1, window_bounds = array<i64: 4, 73>}, {pipeline_mode = #tpu.pipeline_mode<synchronous>, transform_indices = @transform_2, window_bounds = array<i64: 4, 512>}, {pipeline_mode = #tpu.pipeline_mode<synchronous>, transform_indices = @transform_3, window_bounds = array<i64: 4, 512>}]} {
    %c0 = arith.constant 0 : index
    %c0_0 = arith.constant 0 : index
    %0 = vector.load %arg3[%c0, %c0_0] : memref<4x512xf32, #tpu.memory_space<vmem>>, vector<4x512xf32>
    %c0_1 = arith.constant 0 : index
    %c0_2 = arith.constant 0 : index
    %1 = vector.load %arg2[%c0_1, %c0_2] : memref<4x73xf32, #tpu.memory_space<vmem>>, vector<4x73xf32>
    %c0_3 = arith.constant 0 : index
    %c0_4 = arith.constant 0 : index
    %2 = vector.load %arg1[%c0_3, %c0_4] : memref<73x512xf32, #tpu.memory_space<vmem>>, vector<73x512xf32>
    %cst = arith.constant dense<0.000000e+00> : vector<4x512xf32>
    %3 = tpu.matmul %1, %2, %cst {dimension_numbers = #tpu.dot_dimension_numbers<[1], [0], [0], [1], [0, 0, 1, 1], [], []>} : vector<4x73xf32>, vector<73x512xf32>, vector<4x512xf32> -> vector<4x512xf32>
    %4 = arith.addf %0, %3 : vector<4x512xf32>
    %c0_5 = arith.constant 0 : index
    %c0_6 = arith.constant 0 : index
    %5 = vector.load %arg4[%c0_5, %c0_6] : memref<4x512xf32, #tpu.memory_space<vmem>>, vector<4x512xf32>
    tpu.vector_store %arg4[%c0_5, %c0_6], %4 {strides = array<i32>} : memref<4x512xf32, #tpu.memory_space<vmem>>, vector<4x512xf32>,
    return
  }
  func.func @transform_0(%arg0: i32) -> (i32, i32) {
    %c0_i32 = arith.constant 0 : i32
    %c0_i32_0 = arith.constant 0 : i32
    %c0_i32_1 = arith.constant 0 : i32
    return %c0_i32, %c0_i32_0 : i32, i32
  }
  func.func @transform_1(%arg0: i32) -> (i32, i32) {
    %c0_i32 = arith.constant 0 : i32
    %c0_i32_0 = arith.constant 0 : i32
    %c0_i32_1 = arith.constant 0 : i32
    return %c0_i32, %c0_i32_0 : i32, i32
  }
  func.func @transform_2(%arg0: i32) -> (i32, i32) {
    %c0_i32 = arith.constant 0 : i32
    %c0_i32_0 = arith.constant 0 : i32
    %c0_i32_1 = arith.constant 0 : i32
    return %c0_i32, %c0_i32_0 : i32, i32
  }
  func.func @transform_3(%arg0: i32) -> (i32, i32) {
    %c0_i32 = arith.constant 0 : i32
    %c0_i32_0 = arith.constant 0 : i32
    %c0_i32_1 = arith.constant 0 : i32
    return %c0_i32, %c0_i32_0 : i32, i32
  }
}

</mosaic_0001>

<bundles_post_ra>
// kernel: tpu_custom_call.1
= control target key start
LH: loop header
LB: loop body
LE: loop exit
PB: predicated region body
PF: predicated region fallthrough
CT: control target
= control target key end

     0   :  { %8 = vsyncpa [#allocation3], 0  ;;  %s517_s0 = inlined_call_operand.hbm [shape: f32[73,512], index: 0, kind: input, shape index: {}]   ;;  %s518_s1 = inlined_call_operand.hbm [shape: f32[4,73], index: 1, kind: input, shape index: {}]   ;;  %s519_s2 = inlined_call_operand.hbm [shape: f32[4,512], index: 2, kind: input, shape index: {}]   ;;  %s520_s3 = inlined_call_operand.hbm [shape: f32[4,512], index: 3, kind: output, shape index: {}]  }
   0x1   :  { %9 = vsyncpa [#allocation6], 0 }
   0x2   :  { %10 = vsyncpa [#allocation4], 0  ;;  %s434_s12 = smov [#allocation5]   ;;  %s435_s14 = smov [#allocation2]  }
   0x3   :  { %s29_s13 = sshll.u32 %s434_s12, 4  ;;  %s16_s15 = sshll.u32 %s435_s14, 4  ;;  %s30_s13 = int_to_ptr.vmem [resolvable:$true] %s29_s13  ;;  %s462_s15 = int_to_ptr.vmem [resolvable:$true] %s16_s15 }
   0x4   :  { %s340_s18 = scalar_lea.hbm %s518_s1, 64 }
   0x5   :  { %p341_p0 = scmp.ne.s32.totalorder %s518_s1, %s340_s18  ;;  %p344_p1 = scmp.lt.u32.totalorder %s340_s18, %s518_s1 }
   0x7   :  { %p346_p2 = pnand %p344_p1, %p341_p0 }
   0x9   :  { %349 = shalt.err (!%p346_p2)
}
   0xa   :  { %s350_s23 = scalar_lea.vmem %s30_s13, 64  ;;  %p355_p4 = scmp.lt.s32.totalorder %s30_s13, %s30_s13 }
   0xb   :  { %p351_p3 = scmp.ne.s32.totalorder %s30_s13, %s350_s23  ;;  %p356_p5 = scmp.lt.s32.totalorder %s350_s23, %s350_s23 }
   0xd   :  { %p357_p6 = por %p356_p5, %p355_p4 }
   0xf   :  { %p358_p7 = pnand %p357_p6, %p351_p3 }
  0x11   :  { %361 = shalt.err (!%p358_p7)
}
  0x12   :  { %32 = dma.hbm_to_vmem [thread:$0]  %s518_s1, 64, %s30_s13, [#allocation6]  }
  0x13   :  { %s362_s28 = scalar_lea.hbm %s517_s0, 5120 }
  0x14   :  { %p363_p8 = scmp.ne.s32.totalorder %s517_s0, %s362_s28  ;;  %p366_p9 = scmp.lt.u32.totalorder %s362_s28, %s517_s0 }
  0x16   :  { %p368_p10 = pnand %p366_p9, %p363_p8 }
  0x18   :  { %371 = shalt.err (!%p368_p10)
}
  0x19   :  { %s372_s6 = scalar_lea.vmem %s462_s15, 5120  ;;  %p377_p12 = scmp.lt.s32.totalorder %s462_s15, %s462_s15 }
  0x1a   :  { %p373_p11 = scmp.ne.s32.totalorder %s462_s15, %s372_s6  ;;  %p378_p13 = scmp.lt.s32.totalorder %s372_s6, %s372_s6 }
  0x1c   :  { %p379_p0 = por %p378_p13, %p377_p12 }
  0x1e   :  { %p380_p1 = pnand %p379_p0, %p373_p11 }
  0x20   :  { %383 = shalt.err (!%p380_p1)
}
  0x21   :  { %s436_s1 = smov 512   ;;  %s437_s7 = smov 32  }
  0x22   :  { %22 = dma.hbm_to_vmem [thread:$0]  %s517_s0, 5120, %s462_s15, [#allocation3], %s436_s1, %s436_s1, %s437_s7  }
  0x23   :  { %s438_s10 = smov [#allocation7]   ;;  %s384_s14 = scalar_lea.hbm %s519_s2, 256 }
  0x24   :  { %s39_s11 = sshll.u32 %s438_s10, 4  ;;  %p385_p2 = scmp.ne.s32.totalorder %s519_s2, %s384_s14  ;;  %s40_s11 = int_to_ptr.vmem [resolvable:$true] %s39_s11 }
  0x25   :  { %p388_p3 = scmp.lt.u32.totalorder %s384_s14, %s519_s2 }
  0x27   :  { %p390_p4 = pnand %p388_p3, %p385_p2 }
  0x29   :  { %393 = shalt.err (!%p390_p4)
}
  0x2a   :  { %s394_s20 = scalar_lea.vmem %s40_s11, 256  ;;  %p399_p6 = scmp.lt.s32.totalorder %s40_s11, %s40_s11 }
  0x2b   :  { %p395_p5 = scmp.ne.s32.totalorder %s40_s11, %s394_s20  ;;  %p400_p7 = scmp.lt.s32.totalorder %s394_s20, %s394_s20 }
  0x2d   :  { %p401_p8 = por %p400_p7, %p399_p6 }
  0x2f   :  { %p402_p9 = pnand %p401_p8, %p395_p5 }
  0x31   :  { %405 = shalt.err (!%p402_p9)
}
  0x32   :  { %42 = dma.hbm_to_vmem [thread:$0]  %s519_s2, 256, %s40_s11, [#allocation6]  }
  0x33   :  { %428 = dma.done.wait [#allocation3], 5120  }
  0x34   :  { %429 = vsyncadd [#allocation3], 4294962176 }
  0x35   :  { %430 = dma.done.wait [#allocation6], 320  }
  0x36   :  { %431 = vsyncadd [#allocation6], 4294966976  ;;  %v439_v0 = vmov 0.0   ;;  %v56_v1 = vld [vmem:[#allocation2 + $0x8] sm:$0xff]  ;;  %v58_v3 = vld [vmem:[#allocation2 + $0x18] sm:$0xff]  ;;  %vm99_vm0 = vcmask 1040384  }
  0x37   :  { %176 = vmatprep.mubr.f32.mxu0 %v439_v0  ;;  %247 = vmatprep.mubr.f32.mxu1 %v439_v0  ;;  %v60_v2 = vld [vmem:[#allocation2 + $0x28] sm:$0xff]  ;;  %v62_v5 = vld [vmem:[#allocation2 + $0x38] sm:$0xff]  ;;  %v55_v6 = vld [vmem:[#allocation2] sm:$0xff]  ;;  %vm440_vm1 = vmmov 1   ;;  %vm95_vm3 = vcmask 596992   ;;  %s441_s2 = smov [#allocation8]  }
  0x38   :  { %v288_v4 = vpack.c.bf16 %v60_v2, %v56_v1  ;;  %v59_v7 = vld [vmem:[#allocation2 + $0x20] sm:$0xff]  ;;  %v310_v8 = vpack.c.bf16 %v62_v5, %v58_v3  ;;  %v57_v10 = vld [vmem:[#allocation2 + $0x10] sm:$0xff]  ;;  %v64_v12 = vld [vmem:[#allocation2 + $0x48] sm:$0xff]  ;;  %s272_s21 = sshll.u32 %s441_s2, 4  ;;  %s273_s21 = int_to_ptr.vmem [resolvable:$true] %s272_s21 }
  0x39   :  { %v290_v9 = vpack.c.bf16 %v59_v7, %v55_v6  ;;  %v61_v11 = vld [vmem:[#allocation2 + $0x30] sm:$0xff]  ;;  %v68_v14 = vld [vmem:[#allocation2 + $0x68] sm:$0xff]  ;;  %v66_v15 = vld [vmem:[#allocation2 + $0x58] sm:$0xff]  ;;  %s406_s22 = scalar_lea.vmem %s273_s21, 256  ;;  %p411_p11 = scmp.lt.s32.totalorder %s273_s21, %s273_s21 }
  0x3a   :  { %289 = vmatprep.subr.bf16.mxu0 %v288_v4  ;;  %v312_v13 = vpack.c.bf16 %v61_v11, %v57_v10  ;;  %v70_v16 = vld [vmem:[#allocation2 + $0x78] sm:$0xff]  ;;  %311 = vmatprep.subr.bf16.mxu1 %v310_v8  ;;  %v292_v17 = vpack.c.bf16 %v68_v14, %v64_v12  ;;  %v63_v19 = vld [vmem:[#allocation2 + $0x40] sm:$0xff]  ;;  %v65_v21 = vld [vmem:[#allocation2 + $0x50] sm:$0xff]  ;;  %p407_p10 = scmp.ne.s32.totalorder %s273_s21, %s406_s22  ;;  %p412_p12 = scmp.lt.s32.totalorder %s406_s22, %s406_s22 }
  0x3b   :  { %291 = vmatpush1.bf16.msra.mxu0 %v290_v9  ;;  %v314_v18 = vpack.c.bf16 %v70_v16, %v66_v15  ;;  %v67_v20 = vld [vmem:[#allocation2 + $0x60] sm:$0xff]  ;;  %v69_v23 = vld [vmem:[#allocation2 + $0x70] sm:$0xff]  ;;  %v72_v24 = vld [vmem:[#allocation2 + $0x88] sm:$0xff] }
  0x3c   :  { %313 = vmatpush1.bf16.msra.mxu1 %v312_v13  ;;  %v294_v22 = vpack.c.bf16 %v67_v20, %v63_v19  ;;  %v76_v25 = vld [vmem:[#allocation2 + $0xa8] sm:$0xff]  ;;  %293 = vmatprep.subr.bf16.mxu0 %v292_v17  ;;  %v316_v26 = vpack.c.bf16 %v69_v23, %v65_v21  ;;  %v74_v28 = vld [vmem:[#allocation2 + $0x98] sm:$0xff]  ;;  %v71_v30 = vld [vmem:[#allocation2 + $0x80] sm:$0xff]  ;;  %p413_p13 = por %p412_p12, %p411_p11 }
  0x3d   :  { %315 = vmatprep.subr.bf16.mxu1 %v314_v18  ;;  %v296_v27 = vpack.c.bf16 %v76_v25, %v72_v24  ;;  %v78_v29 = vld [vmem:[#allocation2 + $0xb8] sm:$0xff]  ;;  %v75_v32 = vld [vmem:[#allocation2 + $0xa0] sm:$0xff]  ;;  %v73_v33 = vld [vmem:[#allocation2 + $0x90] sm:$0xff] }
  0x3e   :  { %v318_v31 = vpack.c.bf16 %v78_v29, %v74_v28  ;;  %v77_v34 = vld [vmem:[#allocation2 + $0xb0] sm:$0xff]  ;;  %v298_v35 = vpack.c.bf16 %v75_v32, %v71_v30  ;;  %v80_v36 = vld [vmem:[#allocation2 + $0xc8] sm:$0xff]  ;;  %v82_v38 = vld [vmem:[#allocation2 + $0xd8] sm:$0xff]  ;;  %p414_p0 = pnand %p413_p13, %p407_p10 }
  0x3f   :  { %295 = vmatpush1.bf16.msra.mxu0 %v294_v22  ;;  %v84_v37 = vld [vmem:[#allocation2 + $0xe8] sm:$0xff]  ;;  %v320_v39 = vpack.c.bf16 %v77_v34, %v73_v33  ;;  %v86_v41 = vld [vmem:[#allocation2 + $0xf8] sm:$0xff]  ;;  %v79_v42 = vld [vmem:[#allocation2 + $0xc0] sm:$0xff] }
  0x40   :  { %317 = vmatpush1.bf16.msra.mxu1 %v316_v26  ;;  %297 = vmatprep.subr.bf16.mxu0 %v296_v27  ;;  %v300_v40 = vpack.c.bf16 %v84_v37, %v80_v36  ;;  %v83_v43 = vld [vmem:[#allocation2 + $0xe0] sm:$0xff]  ;;  %v322_v44 = vpack.c.bf16 %v86_v41, %v82_v38  ;;  %v81_v45 = vld [vmem:[#allocation2 + $0xd0] sm:$0xff]  ;;  %v88_v47 = vld [vmem:[#allocation2 + $0x108] sm:$0xff] }
  0x41   :  { %319 = vmatprep.subr.bf16.mxu1 %v318_v31  ;;  %v85_v46 = vld [vmem:[#allocation2 + $0xf0] sm:$0xff]  ;;  %v92_v48 = vld [vmem:[#allocation2 + $0x128] sm:$0x1]  ;;  %v90_v49 = vld [vmem:[#allocation2 + $0x118] sm:$0xff]  ;;  %v302_v51 = vpack.c.bf16 %v83_v43, %v79_v42 }
  0x42   :  { %v94_v50 = vld [vmem:[#allocation2 + $0x138] sm:$0x1]  ;;  %v324_v52 = vpack.c.bf16 %v85_v46, %v81_v45  ;;  %v304_v53 = vpack.c.bf16 %v92_v48, %v88_v47  ;;  %v87_v54 = vld [vmem:[#allocation2 + $0x100] sm:$0xff]  ;;  %vm305_vm2 = vmpackc.low %vm99_vm0, %vm440_vm1 }
  0x43   :  { %299 = vmatpush1.bf16.msra.mxu0 %v298_v35  ;;  %v91_v55 = vld [vmem:[#allocation2 + $0x120] sm:$0x1]  ;;  %v326_v56 = vpack.c.bf16 %v94_v50, %v90_v49  ;;  %v89_v57 = vld [vmem:[#allocation2 + $0x110] sm:$0xff]  ;;  %v52_v0 = vld [vmem:[#allocation7] sm:$0xff] }
  0x44   :  { %321 = vmatpush1.bf16.msra.mxu1 %v320_v39  ;;  %301 = vmatprep.subr.bf16.mxu0 %v300_v40  ;;  %v93_v58 = vld [vmem:[#allocation2 + $0x130] sm:$0x1]  ;;  %v307_v59 = vpack.c.bf16 %v91_v55, %v87_v54  ;;  %v54_v61 = vld [vmem:[#allocation5] sm:$0xf] }
  0x45   :  { %323 = vmatprep.subr.bf16.mxu1 %v322_v44  ;;  %v329_v60 = vpack.c.bf16 %v93_v58, %v89_v57  ;;  %v53_v3 = vld [vmem:[#allocation7 + $0x8] sm:$0xff] }
  0x47   :  { %303 = vmatpush1.bf16.msra.mxu0 %v302_v51 }
  0x48   :  { %325 = vmatpush1.bf16.msra.mxu1 %v324_v52  ;;  %306 = vmatprep.subr.msk.bf16.mxu0 %vm305_vm2, %v304_v53 }
  0x49   :  { %328 = vmatprep.subr.msk.bf16.mxu1 %vm305_vm2, %v326_v56 }
  0x4b   :  { %309 = vmatpush1.bf16.msk.msra.mxu0 %vm305_vm2, %v307_v59 }
  0x4c   :  { %331 = vmatpush1.bf16.msk.msra.mxu1 %vm305_vm2, %v329_v60 }
  0x4e   :  { %284 = vmatmul.mubr.msk.f32.vlgmr.msra.gmra.mrb[0].mxu0 %vm95_vm3, %v54_v61 }
  0x4f   :  { %287 = vmatmul.mubr.msk.f32.vlgmr.msra.gmra.mrb[0].mxu1 %vm95_vm3, %v54_v61 }
 0x121   :  { %v178_v62 = vpop.f32.mrb[0].mxu0 }
 0x122   :  { %v249_v63 = vpop.f32.mrb[0].mxu1  ;;  %v180_v1 = vpop.f32.mrb[1].mxu0 }
 0x123   :  { %v258_v2 = vcombine.low %v178_v62, %v180_v1  ;;  %v251_v4 = vpop.f32.mrb[1].mxu1 }
 0x124   :  { %v259_v5 = vcombine.low %v249_v63, %v251_v4 }
 0x125   :  { %v262_v6 = vadd.f32 %v258_v2, %v52_v0 }
 0x126   :  { %v263_v7 = vadd.f32 %v259_v5, %v53_v3 }
 0x127   :  { %264 = vst [vmem:[#allocation8] sm:$0xff] %v262_v6 }
 0x128   :  { %265 = vst [vmem:[#allocation8 + $0x8] sm:$0xff] %v263_v7 }
 0x129   :  { %417 = shalt.err (!%p414_p0)
}
 0x12a   :  { %s418_s25 = scalar_lea.hbm %s520_s3, 256 }
 0x12b   :  { %p419_p1 = scmp.ne.s32.totalorder %s520_s3, %s418_s25  ;;  %p422_p2 = scmp.lt.u32.totalorder %s418_s25, %s520_s3 }
 0x12d   :  { %p424_p3 = pnand %p422_p2, %p419_p1 }
 0x12f   :  { %427 = shalt.err (!%p424_p3)
}
 0x130   :  { %275 = dma.vmem_to_hbm [thread:$0]  %s273_s21, 256, %s520_s3, [#allocation4]  }
 0x131   :  { %432 = dma.done.wait [#allocation4], 256  }
 0x132   :  { %433 = vsyncadd [#allocation4], 4294967040 }
 0x133   :  { %279 = vsyncpa [#allocation3], 1 }
 0x134   :  { %280 = vsyncpa [#allocation6], 1 }
 0x135   :  { %281 = vsyncpa [#allocation4], 1 }

</bundles_post_ra>
